<compile_context>
chip_gen: v7x
topology: tpu7x:2x2x1
jax: 0.10.0
libtpu: 0.0.40
codegen_flags: <defaults>
</compile_context>

<pallas_src>
import functools

import jax
import jax.numpy as jnp
from jax.experimental import pallas as pl
from jax.experimental.pallas import tpu as pltpu

EPS = 1e-5
COMPUTE_DTYPE = jnp.bfloat16      # MXU operand dtype (accumulation stays f32)


def _round_up(x, m):
    return (x + m - 1) // m * m


# ------------------------------ Pallas kernel -------------------------------

def _bottleneck_kernel(x_ref, w1_ref, w2_ref, w3_ref, mask_ref,
                       b1_ref, b2_ref, b3_ref, o_ref, stk_ref,
                       *, D, H, W, P8):
    """One batch element, fully fused.  Activations are [channels, M] with the
    flattened spatial index M = D*H*W on the lane axis."""
    cd = COMPUTE_DTYPE
    f32 = jnp.float32
    HW = H * W
    M = D * HW

    x = x_ref[0]                                  # [Cin, M] f32; also residual

    # ---- conv1 (1x1x1, BN folded) + relu ---------------------------- [P8, M]
    h1 = jnp.dot(w1_ref[...].astype(cd), x.astype(cd),
                 preferred_element_type=f32)
    h1 = jnp.maximum(h1 + b1_ref[...], 0.0)

    # ---- conv2 (3x3x3, stride=1, pad=1) + relu ----------------------- [P8, M]
    # Tap (kd,kh,kw) needs h1 at flattened index m + off; fetch it with a
    # static circular lane roll (XLU) and zero the positions whose neighbour
    # falls in the implicit zero padding (precomputed host-side mask).  All 27
    # taps are staged into one [27*P8, M] buffer and consumed by one matmul.
    tap = 0
    for kd in (-1, 0, 1):
        for kh in (-1, 0, 1):
            for kw in (-1, 0, 1):
                off = kd * HW + kh * W + kw
                shifted = h1 if off == 0 else pltpu.roll(h1, (-off) % M, axis=1)
                stk_ref[pl.ds(tap * P8, P8), :] = shifted * mask_ref[tap]
                tap += 1
    h2 = jnp.dot(w2_ref[...].astype(cd), stk_ref[...].astype(cd),
                 preferred_element_type=f32)
    h2 = jnp.maximum(h2 + b2_ref[...], 0.0)

    # ---- conv3 (1x1x1, BN folded) + residual + relu --------------- [Cout, M]
    out = jnp.dot(w3_ref[...].astype(cd), h2.astype(cd),
                  preferred_element_type=f32)
    out = out + b3_ref[...] + x                   # downsample is None
    o_ref[0] = jnp.maximum(out, 0.0).astype(o_ref.dtype)


# --------------------------- BN folding (eval mode) ---------------------------

def fold_bn_params(params):
    """Fold the eval-mode BatchNorm scale into the conv weights (exact
    identity:  s * (W @ x) + b  ==  (s[:,None] * W) @ x + b )."""
    return dict(
        w1=params["s1"][:, None] * params["w1"],                      # [P, Cin]
        w2=params["s2"][None, None, None, :, None] * params["w2"],    # [3,3,3,P,P]
        w3=params["s3"][:, None] * params["w3"],                      # [Cout, P]
        b1=params["b1"], b2=params["b2"], b3=params["b3"],
    )


# --------------------------------- wrapper -----------------------------------

def bottleneck_forward(x, params):
    """Bottleneck.forward (stride=1, downsample=None).  x: [N, C, D, H, W]."""
    N, C, D, H, W = x.shape
    M = D * H * W                       # best perf when M is a multiple of 128
    fp = fold_bn_params(params)
    planes = fp["w1"].shape[0]
    cout = fp["w3"].shape[0]
    assert cout == C, "downsample=None requires in_planes == planes*expansion"

    p8 = _round_up(planes, 8)           # pad bottleneck width to sublanes
    f32 = jnp.float32

    # Pack the (tiny) folded parameters into the kernel layout once.  A
    # PyTorch conv weight [out, in, kD, kH, kW] maps to this logical layout
    # via w1 = weight[:, :, 0, 0, 0], w2 = weight.transpose(2, 3, 4, 0, 1),
    # w3 = weight[:, :, 0, 0, 0].
    w1 = jnp.zeros((p8, C), f32).at[:planes, :].set(fp["w1"])
    w2t = fp["w2"].reshape(27, planes, planes)                         # [tap,out,in]
    w2t = jnp.pad(w2t, ((0, 0), (0, p8 - planes), (0, p8 - planes)))   # [27,p8,p8]
    w2 = w2t.transpose(1, 0, 2).reshape(p8, 27 * p8)   # column = tap*p8 + in_ch
    w3 = jnp.zeros((cout, p8), f32).at[:, :planes].set(fp["w3"])

    def col(v, n):                      # [c] -> zero-padded [n, 1] bias column
        return jnp.zeros((n, 1), f32).at[:v.shape[0], 0].set(v)

    b1, b2 = col(fp["b1"], p8), col(fp["b2"], p8)
    b3 = fp["b3"].reshape(cout, 1)

    # Halo masks for the 27 taps: 1.0 where the shifted neighbour lies inside
    # the volume, 0.0 where the implicit zero-padding would be read.
    d_i, h_i, w_i = jnp.meshgrid(jnp.arange(D), jnp.arange(H), jnp.arange(W),
                                 indexing="ij")
    masks = []
    for kd in (-1, 0, 1):
        for kh in (-1, 0, 1):
            for kw in (-1, 0, 1):
                ok = ((d_i + kd >= 0) & (d_i + kd < D) &
                      (h_i + kh >= 0) & (h_i + kh < H) &
                      (w_i + kw >= 0) & (w_i + kw < W))
                masks.append(ok.reshape(1, M))
    tap_mask = jnp.stack(masks).astype(f32)            # [27, 1, M]

    x3 = x.reshape(N, C, M)             # NCDHW is channel-major: free reshape

    kernel = functools.partial(_bottleneck_kernel, D=D, H=H, W=W, P8=p8)
    out3 = pl.pallas_call(
        kernel,
        out_shape=jax.ShapeDtypeStruct((N, cout, M), x.dtype),
        grid_spec=pltpu.PrefetchScalarGridSpec(
            num_scalar_prefetch=0,
            grid=(N,),
            in_specs=[
                pl.BlockSpec((1, C, M), lambda n: (n, 0, 0)),        # x
                pl.BlockSpec((p8, C), lambda n: (0, 0)),             # w1 (folded)
                pl.BlockSpec((p8, 27 * p8), lambda n: (0, 0)),       # w2 (folded)
                pl.BlockSpec((cout, p8), lambda n: (0, 0)),          # w3 (folded)
                pl.BlockSpec((27, 1, M), lambda n: (0, 0, 0)),       # tap masks
                pl.BlockSpec((p8, 1), lambda n: (0, 0)),             # b1
                pl.BlockSpec((p8, 1), lambda n: (0, 0)),             # b2
                pl.BlockSpec((cout, 1), lambda n: (0, 0)),           # b3
            ],
            out_specs=pl.BlockSpec((1, cout, M), lambda n: (n, 0, 0)),
            scratch_shapes=[pltpu.VMEM((27 * p8, M), jnp.float32)],  # tap staging
        ),
        compiler_params=pltpu.CompilerParams(
            dimension_semantics=("parallel",),        # shard batch across TCs
            vmem_limit_bytes=32 * 1024 * 1024,
        ),
    )(x3, w1, w2, w3, tap_mask, b1, b2, b3)
    return out3.reshape(N, cout, D, H, W)


# -------------------------- parameter initialization -------------------------

def init_params(key, in_planes, planes, expansion=4):
    ks = jax.random.split(key, 15)

    def bn_fold(kg, kb, km, kv, c):
        # Eval-mode BN with running stats:  s = gamma / sqrt(var + eps),
        #                                   b = beta - mean * s
        gamma = 1.0 + 0.1 * jax.random.normal(kg, (c,), jnp.float32)
        beta = 0.1 * jax.random.normal(kb, (c,), jnp.float32)
        mean = 0.1 * jax.random.normal(km, (c,), jnp.float32)
        var = jnp.abs(jax.random.normal(kv, (c,), jnp.float32)) + 0.5
        scale = gamma / jnp.sqrt(var + EPS)
        shift = beta - mean * scale
        return scale, shift

    # Logical layouts: w1 [planes, in], w2 [kd, kh, kw, out, in], w3 [out, planes]
    w1 = 0.1 * jax.random.normal(ks[0], (planes, in_planes), jnp.float32)
    w2 = 0.1 * jax.random.normal(ks[1], (3, 3, 3, planes, planes), jnp.float32)
    w3 = 0.1 * jax.random.normal(ks[2], (planes * expansion, planes), jnp.float32)
    s1, b1 = bn_fold(ks[3], ks[4], ks[5], ks[6], planes)
    s2, b2 = bn_fold(ks[7], ks[8], ks[9], ks[10], planes)
    s3, b3 = bn_fold(ks[11], ks[12], ks[13], ks[14], planes * expansion)
    return dict(w1=w1, w2=w2, w3=w3, s1=s1, b1=b1, s2=s2, b2=b2, s3=s3, b3=b3)


# ------------------------------ plain-JAX reference ---------------------------

def reference_forward(x, params):
    """XLA reference: same folded-BN weights and the same bf16-operand /
    f32-accumulate matmul precision as the kernel (only the conv machinery —
    rolls, masks, tap stacking, residual — differs)."""
    cd = COMPUTE_DTYPE
    f32 = jnp.float32
    fp = fold_bn_params(params)
    N, C, D, H, W = x.shape
    planes = fp["w1"].shape[0]
    bc = lambda v: v[None, :, None, None, None]

    h = jnp.einsum('ncdhw,pc->npdhw', x.astype(cd), fp["w1"].astype(cd),
                   preferred_element_type=f32)
    h = jnp.maximum(h + bc(fp["b1"]), 0.0)

    hp = jnp.pad(h, ((0, 0), (0, 0), (1, 1), (1, 1), (1, 1)))
    acc = jnp.zeros((N, planes, D, H, W), f32)
    for kd in range(3):
        for kh in range(3):
            for kw in range(3):
                acc = acc + jnp.einsum(
                    'ncdhw,pc->npdhw',
                    hp[:, :, kd:kd + D, kh:kh + H, kw:kw + W].astype(cd),
                    fp["w2"][kd, kh, kw].astype(cd),
                    preferred_element_type=f32)
    h = jnp.maximum(acc + bc(fp["b2"]), 0.0)

    out = jnp.einsum('ncdhw,pc->npdhw', h.astype(cd), fp["w3"].astype(cd),
                     preferred_element_type=f32)
    out = out + bc(fp["b3"]) + x
    return jnp.maximum(out, 0.0)


# ------------------------------------ main ------------------------------------

if __name__ == "__main__":
    key = jax.random.PRNGKey(0)
    kx, kp = jax.random.split(key)

    # Bottleneck(in_planes=16, planes=4, stride=1, downsample=None)
    # (in_planes == planes * expansion so the residual add is valid)
    in_planes, planes, expansion = 16, 4, 4
    N, D, H, W = 2, 4, 8, 8            # D*H*W = 256 -> lane-dense tiles

    x = jax.random.normal(kx, (N, in_planes, D, H, W), jnp.float32)
    params = init_params(kp, in_planes, planes, expansion)

    fwd = jax.jit(bottleneck_forward)
    out = jax.block_until_ready(fwd(x, params))

    ref = reference_forward(x, params)
    assert out.shape == (N, planes * expansion, D, H, W), out.shape
    max_err = float(jnp.max(jnp.abs(out - ref)))
    assert jnp.allclose(out, ref, rtol=1e-2, atol=1e-2), max_err

    print("KERNEL_OK")
</pallas_src>

<mosaic_0001>
module attributes {stable_mosaic.version = 11 : i64} {
  func.func @_bottleneck_kernel(%arg0: i32, %arg1: memref<1x16x256xf32, #tpu.memory_space<vmem>>, %arg2: memref<8x16xf32, #tpu.memory_space<vmem>>, %arg3: memref<8x216xf32, #tpu.memory_space<vmem>>, %arg4: memref<16x8xf32, #tpu.memory_space<vmem>>, %arg5: memref<27x1x256xf32, #tpu.memory_space<vmem>>, %arg6: memref<8x1xf32, #tpu.memory_space<vmem>>, %arg7: memref<8x1xf32, #tpu.memory_space<vmem>>, %arg8: memref<16x1xf32, #tpu.memory_space<vmem>>, %arg9: memref<1x16x256xf32, #tpu.memory_space<vmem>>, %arg10: memref<216x256xf32, #tpu.memory_space<vmem>>) attributes {dimension_semantics = [#tpu.dimension_semantics<parallel>], iteration_bounds = array<i64: 2>, scalar_prefetch = 0 : i64, scratch_operands = 1 : i64, tpu.core_type = #tpu.core_type<tc>, window_params = [{transform_indices = @transform_0, window_bounds = array<i64: 1, 16, 256>}, {pipeline_mode = #tpu.pipeline_mode<synchronous>, transform_indices = @transform_1, window_bounds = array<i64: 8, 16>}, {pipeline_mode = #tpu.pipeline_mode<synchronous>, transform_indices = @transform_2, window_bounds = array<i64: 8, 216>}, {pipeline_mode = #tpu.pipeline_mode<synchronous>, transform_indices = @transform_3, window_bounds = array<i64: 16, 8>}, {pipeline_mode = #tpu.pipeline_mode<synchronous>, transform_indices = @transform_4, window_bounds = array<i64: 27, 1, 256>}, {pipeline_mode = #tpu.pipeline_mode<synchronous>, transform_indices = @transform_5, window_bounds = array<i64: 8, 1>}, {pipeline_mode = #tpu.pipeline_mode<synchronous>, transform_indices = @transform_6, window_bounds = array<i64: 8, 1>}, {pipeline_mode = #tpu.pipeline_mode<synchronous>, transform_indices = @transform_7, window_bounds = array<i64: 16, 1>}, {transform_indices = @transform_8, window_bounds = array<i64: 1, 16, 256>}]} {
    %c0 = arith.constant 0 : index
    %c0_0 = arith.constant 0 : index
    %c0_1 = arith.constant 0 : index
    %0 = vector.load %arg1[%c0, %c0_0, %c0_1] : memref<1x16x256xf32, #tpu.memory_space<vmem>>, vector<1x16x256xf32>
    %1 = vector.shape_cast %0 : vector<1x16x256xf32> to vector<16x256xf32>
    %c0_2 = arith.constant 0 : index
    %c0_3 = arith.constant 0 : index
    %2 = vector.load %arg2[%c0_2, %c0_3] : memref<8x16xf32, #tpu.memory_space<vmem>>, vector<8x16xf32>
    %3 = arith.truncf %2 : vector<8x16xf32> to vector<8x16xbf16>
    %4 = arith.truncf %1 : vector<16x256xf32> to vector<16x256xbf16>
    %cst = arith.constant dense<0.000000e+00> : vector<8x256xf32>
    %5 = tpu.matmul %3, %4, %cst {dimension_numbers = #tpu.dot_dimension_numbers<[1], [0], [0], [1], [0, 0, 1, 1], [], []>} : vector<8x16xbf16>, vector<16x256xbf16>, vector<8x256xf32> -> vector<8x256xf32>
    %c0_4 = arith.constant 0 : index
    %c0_5 = arith.constant 0 : index
    %6 = vector.load %arg6[%c0_4, %c0_5] : memref<8x1xf32, #tpu.memory_space<vmem>>, vector<8x1xf32>
    %7 = vector.broadcast %6 : vector<8x1xf32> to vector<8x256xf32>
    %8 = arith.addf %5, %7 : vector<8x256xf32>
    %cst_6 = arith.constant 0.000000e+00 : f32
    %9 = vector.broadcast %cst_6 : f32 to vector<8x256xf32>
    %10 = arith.maximumf %8, %9 : vector<8x256xf32>
    %c73_i32 = arith.constant 73 : i32
    %11 = tpu.dynamic_rotate %10 by %c73_i32 dim 1 : vector<8x256xf32>, i32 -> vector<8x256xf32>
    %c0_7 = arith.constant 0 : index
    %c0_8 = arith.constant 0 : index
    %c0_9 = arith.constant 0 : index
    %12 = vector.load %arg5[%c0_7, %c0_8, %c0_9] : memref<27x1x256xf32, #tpu.memory_space<vmem>>, vector<1x1x256xf32>
    %13 = vector.shape_cast %12 : vector<1x1x256xf32> to vector<1x256xf32>
    %14 = vector.broadcast %13 : vector<1x256xf32> to vector<8x256xf32>
    %15 = arith.mulf %11, %14 : vector<8x256xf32>
    %c0_10 = arith.constant 0 : index
    %c0_11 = arith.constant 0 : index
    %16 = vector.load %arg10[%c0_10, %c0_11] : memref<216x256xf32, #tpu.memory_space<vmem>>, vector<8x256xf32>
    tpu.vector_store %arg10[%c0_10, %c0_11], %15 {strides = array<i32>} : memref<216x256xf32, #tpu.memory_space<vmem>>, vector<8x256xf32>,
    %c72_i32 = arith.constant 72 : i32
    %17 = tpu.dynamic_rotate %10 by %c72_i32 dim 1 : vector<8x256xf32>, i32 -> vector<8x256xf32>
    %c1 = arith.constant 1 : index
    %c0_12 = arith.constant 0 : index
    %c0_13 = arith.constant 0 : index
    %18 = vector.load %arg5[%c1, %c0_12, %c0_13] : memref<27x1x256xf32, #tpu.memory_space<vmem>>, vector<1x1x256xf32>
    %19 = vector.shape_cast %18 : vector<1x1x256xf32> to vector<1x256xf32>
    %20 = vector.broadcast %19 : vector<1x256xf32> to vector<8x256xf32>
    %21 = arith.mulf %17, %20 : vector<8x256xf32>
    %c8 = arith.constant 8 : index
    %c0_14 = arith.constant 0 : index
    %22 = vector.load %arg10[%c8, %c0_14] : memref<216x256xf32, #tpu.memory_space<vmem>>, vector<8x256xf32>
    tpu.vector_store %arg10[%c8, %c0_14], %21 {strides = array<i32>} : memref<216x256xf32, #tpu.memory_space<vmem>>, vector<8x256xf32>,
    %c71_i32 = arith.constant 71 : i32
    %23 = tpu.dynamic_rotate %10 by %c71_i32 dim 1 : vector<8x256xf32>, i32 -> vector<8x256xf32>
    %c2 = arith.constant 2 : index
    %c0_15 = arith.constant 0 : index
    %c0_16 = arith.constant 0 : index
    %24 = vector.load %arg5[%c2, %c0_15, %c0_16] : memref<27x1x256xf32, #tpu.memory_space<vmem>>, vector<1x1x256xf32>
    %25 = vector.shape_cast %24 : vector<1x1x256xf32> to vector<1x256xf32>
    %26 = vector.broadcast %25 : vector<1x256xf32> to vector<8x256xf32>
    %27 = arith.mulf %23, %26 : vector<8x256xf32>
    %c16 = arith.constant 16 : index
    %c0_17 = arith.constant 0 : index
    %28 = vector.load %arg10[%c16, %c0_17] : memref<216x256xf32, #tpu.memory_space<vmem>>, vector<8x256xf32>
    tpu.vector_store %arg10[%c16, %c0_17], %27 {strides = array<i32>} : memref<216x256xf32, #tpu.memory_space<vmem>>, vector<8x256xf32>,
    %c65_i32 = arith.constant 65 : i32
    %29 = tpu.dynamic_rotate %10 by %c65_i32 dim 1 : vector<8x256xf32>, i32 -> vector<8x256xf32>
    %c3 = arith.constant 3 : index
    %c0_18 = arith.constant 0 : index
    %c0_19 = arith.constant 0 : index
    %30 = vector.load %arg5[%c3, %c0_18, %c0_19] : memref<27x1x256xf32, #tpu.memory_space<vmem>>, vector<1x1x256xf32>
    %31 = vector.shape_cast %30 : vector<1x1x256xf32> to vector<1x256xf32>
    %32 = vector.broadcast %31 : vector<1x256xf32> to vector<8x256xf32>
    %33 = arith.mulf %29, %32 : vector<8x256xf32>
    %c24 = arith.constant 24 : index
    %c0_20 = arith.constant 0 : index
    %34 = vector.load %arg10[%c24, %c0_20] : memref<216x256xf32, #tpu.memory_space<vmem>>, vector<8x256xf32>
    tpu.vector_store %arg10[%c24, %c0_20], %33 {strides = array<i32>} : memref<216x256xf32, #tpu.memory_space<vmem>>, vector<8x256xf32>,
    %c64_i32 = arith.constant 64 : i32
    %35 = tpu.dynamic_rotate %10 by %c64_i32 dim 1 : vector<8x256xf32>, i32 -> vector<8x256xf32>
    %c4 = arith.constant 4 : index
    %c0_21 = arith.constant 0 : index
    %c0_22 = arith.constant 0 : index
    %36 = vector.load %arg5[%c4, %c0_21, %c0_22] : memref<27x1x256xf32, #tpu.memory_space<vmem>>, vector<1x1x256xf32>
    %37 = vector.shape_cast %36 : vector<1x1x256xf32> to vector<1x256xf32>
    %38 = vector.broadcast %37 : vector<1x256xf32> to vector<8x256xf32>
    %39 = arith.mulf %35, %38 : vector<8x256xf32>
    %c32 = arith.constant 32 : index
    %c0_23 = arith.constant 0 : index
    %40 = vector.load %arg10[%c32, %c0_23] : memref<216x256xf32, #tpu.memory_space<vmem>>, vector<8x256xf32>
    tpu.vector_store %arg10[%c32, %c0_23], %39 {strides = array<i32>} : memref<216x256xf32, #tpu.memory_space<vmem>>, vector<8x256xf32>,
    %c63_i32 = arith.constant 63 : i32
    %41 = tpu.dynamic_rotate %10 by %c63_i32 dim 1 : vector<8x256xf32>, i32 -> vector<8x256xf32>
    %c5 = arith.constant 5 : index
    %c0_24 = arith.constant 0 : index
    %c0_25 = arith.constant 0 : index
    %42 = vector.load %arg5[%c5, %c0_24, %c0_25] : memref<27x1x256xf32, #tpu.memory_space<vmem>>, vector<1x1x256xf32>
    %43 = vector.shape_cast %42 : vector<1x1x256xf32> to vector<1x256xf32>
    %44 = vector.broadcast %43 : vector<1x256xf32> to vector<8x256xf32>
    %45 = arith.mulf %41, %44 : vector<8x256xf32>
    %c40 = arith.constant 40 : index
    %c0_26 = arith.constant 0 : index
    %46 = vector.load %arg10[%c40, %c0_26] : memref<216x256xf32, #tpu.memory_space<vmem>>, vector<8x256xf32>
    tpu.vector_store %arg10[%c40, %c0_26], %45 {strides = array<i32>} : memref<216x256xf32, #tpu.memory_space<vmem>>, vector<8x256xf32>,
    %c57_i32 = arith.constant 57 : i32
    %47 = tpu.dynamic_rotate %10 by %c57_i32 dim 1 : vector<8x256xf32>, i32 -> vector<8x256xf32>
    %c6 = arith.constant 6 : index
    %c0_27 = arith.constant 0 : index
    %c0_28 = arith.constant 0 : index
    %48 = vector.load %arg5[%c6, %c0_27, %c0_28] : memref<27x1x256xf32, #tpu.memory_space<vmem>>, vector<1x1x256xf32>
    %49 = vector.shape_cast %48 : vector<1x1x256xf32> to vector<1x256xf32>
    %50 = vector.broadcast %49 : vector<1x256xf32> to vector<8x256xf32>
    %51 = arith.mulf %47, %50 : vector<8x256xf32>
    %c48 = arith.constant 48 : index
    %c0_29 = arith.constant 0 : index
    %52 = vector.load %arg10[%c48, %c0_29] : memref<216x256xf32, #tpu.memory_space<vmem>>, vector<8x256xf32>
    tpu.vector_store %arg10[%c48, %c0_29], %51 {strides = array<i32>} : memref<216x256xf32, #tpu.memory_space<vmem>>, vector<8x256xf32>,
    %c56_i32 = arith.constant 56 : i32
    %53 = tpu.dynamic_rotate %10 by %c56_i32 dim 1 : vector<8x256xf32>, i32 -> vector<8x256xf32>
    %c7 = arith.constant 7 : index
    %c0_30 = arith.constant 0 : index
    %c0_31 = arith.constant 0 : index
    %54 = vector.load %arg5[%c7, %c0_30, %c0_31] : memref<27x1x256xf32, #tpu.memory_space<vmem>>, vector<1x1x256xf32>
    %55 = vector.shape_cast %54 : vector<1x1x256xf32> to vector<1x256xf32>
    %56 = vector.broadcast %55 : vector<1x256xf32> to vector<8x256xf32>
    %57 = arith.mulf %53, %56 : vector<8x256xf32>
    %c56 = arith.constant 56 : index
    %c0_32 = arith.constant 0 : index
    %58 = vector.load %arg10[%c56, %c0_32] : memref<216x256xf32, #tpu.memory_space<vmem>>, vector<8x256xf32>
    tpu.vector_store %arg10[%c56, %c0_32], %57 {strides = array<i32>} : memref<216x256xf32, #tpu.memory_space<vmem>>, vector<8x256xf32>,
    %c55_i32 = arith.constant 55 : i32
    %59 = tpu.dynamic_rotate %10 by %c55_i32 dim 1 : vector<8x256xf32>, i32 -> vector<8x256xf32>
    %c8_33 = arith.constant 8 : index
    %c0_34 = arith.constant 0 : index
    %c0_35 = arith.constant 0 : index
    %60 = vector.load %arg5[%c8_33, %c0_34, %c0_35] : memref<27x1x256xf32, #tpu.memory_space<vmem>>, vector<1x1x256xf32>
    %61 = vector.shape_cast %60 : vector<1x1x256xf32> to vector<1x256xf32>
    %62 = vector.broadcast %61 : vector<1x256xf32> to vector<8x256xf32>
    %63 = arith.mulf %59, %62 : vector<8x256xf32>
    %c64 = arith.constant 64 : index
    %c0_36 = arith.constant 0 : index
    %64 = vector.load %arg10[%c64, %c0_36] : memref<216x256xf32, #tpu.memory_space<vmem>>, vector<8x256xf32>
    tpu.vector_store %arg10[%c64, %c0_36], %63 {strides = array<i32>} : memref<216x256xf32, #tpu.memory_space<vmem>>, vector<8x256xf32>,
    %c9_i32 = arith.constant 9 : i32
    %65 = tpu.dynamic_rotate %10 by %c9_i32 dim 1 : vector<8x256xf32>, i32 -> vector<8x256xf32>
    %c9 = arith.constant 9 : index
    %c0_37 = arith.constant 0 : index
    %c0_38 = arith.constant 0 : index
    %66 = vector.load %arg5[%c9, %c0_37, %c0_38] : memref<27x1x256xf32, #tpu.memory_space<vmem>>, vector<1x1x256xf32>
    %67 = vector.shape_cast %66 : vector<1x1x256xf32> to vector<1x256xf32>
    %68 = vector.broadcast %67 : vector<1x256xf32> to vector<8x256xf32>
    %69 = arith.mulf %65, %68 : vector<8x256xf32>
    %c72 = arith.constant 72 : index
    %c0_39 = arith.constant 0 : index
    %70 = vector.load %arg10[%c72, %c0_39] : memref<216x256xf32, #tpu.memory_space<vmem>>, vector<8x256xf32>
    tpu.vector_store %arg10[%c72, %c0_39], %69 {strides = array<i32>} : memref<216x256xf32, #tpu.memory_space<vmem>>, vector<8x256xf32>,
    %c8_i32 = arith.constant 8 : i32
    %71 = tpu.dynamic_rotate %10 by %c8_i32 dim 1 : vector<8x256xf32>, i32 -> vector<8x256xf32>
    %c10 = arith.constant 10 : index
    %c0_40 = arith.constant 0 : index
    %c0_41 = arith.constant 0 : index
    %72 = vector.load %arg5[%c10, %c0_40, %c0_41] : memref<27x1x256xf32, #tpu.memory_space<vmem>>, vector<1x1x256xf32>
    %73 = vector.shape_cast %72 : vector<1x1x256xf32> to vector<1x256xf32>
    %74 = vector.broadcast %73 : vector<1x256xf32> to vector<8x256xf32>
    %75 = arith.mulf %71, %74 : vector<8x256xf32>
    %c80 = arith.constant 80 : index
    %c0_42 = arith.constant 0 : index
    %76 = vector.load %arg10[%c80, %c0_42] : memref<216x256xf32, #tpu.memory_space<vmem>>, vector<8x256xf32>
    tpu.vector_store %arg10[%c80, %c0_42], %75 {strides = array<i32>} : memref<216x256xf32, #tpu.memory_space<vmem>>, vector<8x256xf32>,
    %c7_i32 = arith.constant 7 : i32
    %77 = tpu.dynamic_rotate %10 by %c7_i32 dim 1 : vector<8x256xf32>, i32 -> vector<8x256xf32>
    %c11 = arith.constant 11 : index
    %c0_43 = arith.constant 0 : index
    %c0_44 = arith.constant 0 : index
    %78 = vector.load %arg5[%c11, %c0_43, %c0_44] : memref<27x1x256xf32, #tpu.memory_space<vmem>>, vector<1x1x256xf32>
    %79 = vector.shape_cast %78 : vector<1x1x256xf32> to vector<1x256xf32>
    %80 = vector.broadcast %79 : vector<1x256xf32> to vector<8x256xf32>
    %81 = arith.mulf %77, %80 : vector<8x256xf32>
    %c88 = arith.constant 88 : index
    %c0_45 = arith.constant 0 : index
    %82 = vector.load %arg10[%c88, %c0_45] : memref<216x256xf32, #tpu.memory_space<vmem>>, vector<8x256xf32>
    tpu.vector_store %arg10[%c88, %c0_45], %81 {strides = array<i32>} : memref<216x256xf32, #tpu.memory_space<vmem>>, vector<8x256xf32>,
    %c1_i32 = arith.constant 1 : i32
    %83 = tpu.dynamic_rotate %10 by %c1_i32 dim 1 : vector<8x256xf32>, i32 -> vector<8x256xf32>
    %c12 = arith.constant 12 : index
    %c0_46 = arith.constant 0 : index
    %c0_47 = arith.constant 0 : index
    %84 = vector.load %arg5[%c12, %c0_46, %c0_47] : memref<27x1x256xf32, #tpu.memory_space<vmem>>, vector<1x1x256xf32>
    %85 = vector.shape_cast %84 : vector<1x1x256xf32> to vector<1x256xf32>
    %86 = vector.broadcast %85 : vector<1x256xf32> to vector<8x256xf32>
    %87 = arith.mulf %83, %86 : vector<8x256xf32>
    %c96 = arith.constant 96 : index
    %c0_48 = arith.constant 0 : index
    %88 = vector.load %arg10[%c96, %c0_48] : memref<216x256xf32, #tpu.memory_space<vmem>>, vector<8x256xf32>
    tpu.vector_store %arg10[%c96, %c0_48], %87 {strides = array<i32>} : memref<216x256xf32, #tpu.memory_space<vmem>>, vector<8x256xf32>,
    %c13 = arith.constant 13 : index
    %c0_49 = arith.constant 0 : index
    %c0_50 = arith.constant 0 : index
    %89 = vector.load %arg5[%c13, %c0_49, %c0_50] : memref<27x1x256xf32, #tpu.memory_space<vmem>>, vector<1x1x256xf32>
    %90 = vector.shape_cast %89 : vector<1x1x256xf32> to vector<1x256xf32>
    %91 = vector.broadcast %90 : vector<1x256xf32> to vector<8x256xf32>
    %92 = arith.mulf %10, %91 : vector<8x256xf32>
    %c104 = arith.constant 104 : index
    %c0_51 = arith.constant 0 : index
    %93 = vector.load %arg10[%c104, %c0_51] : memref<216x256xf32, #tpu.memory_space<vmem>>, vector<8x256xf32>
    tpu.vector_store %arg10[%c104, %c0_51], %92 {strides = array<i32>} : memref<216x256xf32, #tpu.memory_space<vmem>>, vector<8x256xf32>,
    %c255_i32 = arith.constant 255 : i32
    %94 = tpu.dynamic_rotate %10 by %c255_i32 dim 1 : vector<8x256xf32>, i32 -> vector<8x256xf32>
    %c14 = arith.constant 14 : index
    %c0_52 = arith.constant 0 : index
    %c0_53 = arith.constant 0 : index
    %95 = vector.load %arg5[%c14, %c0_52, %c0_53] : memref<27x1x256xf32, #tpu.memory_space<vmem>>, vector<1x1x256xf32>
    %96 = vector.shape_cast %95 : vector<1x1x256xf32> to vector<1x256xf32>
    %97 = vector.broadcast %96 : vector<1x256xf32> to vector<8x256xf32>
    %98 = arith.mulf %94, %97 : vector<8x256xf32>
    %c112 = arith.constant 112 : index
    %c0_54 = arith.constant 0 : index
    %99 = vector.load %arg10[%c112, %c0_54] : memref<216x256xf32, #tpu.memory_space<vmem>>, vector<8x256xf32>
    tpu.vector_store %arg10[%c112, %c0_54], %98 {strides = array<i32>} : memref<216x256xf32, #tpu.memory_space<vmem>>, vector<8x256xf32>,
    %c249_i32 = arith.constant 249 : i32
    %100 = tpu.dynamic_rotate %10 by %c249_i32 dim 1 : vector<8x256xf32>, i32 -> vector<8x256xf32>
    %c15 = arith.constant 15 : index
    %c0_55 = arith.constant 0 : index
    %c0_56 = arith.constant 0 : index
    %101 = vector.load %arg5[%c15, %c0_55, %c0_56] : memref<27x1x256xf32, #tpu.memory_space<vmem>>, vector<1x1x256xf32>
    %102 = vector.shape_cast %101 : vector<1x1x256xf32> to vector<1x256xf32>
    %103 = vector.broadcast %102 : vector<1x256xf32> to vector<8x256xf32>
    %104 = arith.mulf %100, %103 : vector<8x256xf32>
    %c120 = arith.constant 120 : index
    %c0_57 = arith.constant 0 : index
    %105 = vector.load %arg10[%c120, %c0_57] : memref<216x256xf32, #tpu.memory_space<vmem>>, vector<8x256xf32>
    tpu.vector_store %arg10[%c120, %c0_57], %104 {strides = array<i32>} : memref<216x256xf32, #tpu.memory_space<vmem>>, vector<8x256xf32>,
    %c248_i32 = arith.constant 248 : i32
    %106 = tpu.dynamic_rotate %10 by %c248_i32 dim 1 : vector<8x256xf32>, i32 -> vector<8x256xf32>
    %c16_58 = arith.constant 16 : index
    %c0_59 = arith.constant 0 : index
    %c0_60 = arith.constant 0 : index
    %107 = vector.load %arg5[%c16_58, %c0_59, %c0_60] : memref<27x1x256xf32, #tpu.memory_space<vmem>>, vector<1x1x256xf32>
    %108 = vector.shape_cast %107 : vector<1x1x256xf32> to vector<1x256xf32>
    %109 = vector.broadcast %108 : vector<1x256xf32> to vector<8x256xf32>
    %110 = arith.mulf %106, %109 : vector<8x256xf32>
    %c128 = arith.constant 128 : index
    %c0_61 = arith.constant 0 : index
    %111 = vector.load %arg10[%c128, %c0_61] : memref<216x256xf32, #tpu.memory_space<vmem>>, vector<8x256xf32>
    tpu.vector_store %arg10[%c128, %c0_61], %110 {strides = array<i32>} : memref<216x256xf32, #tpu.memory_space<vmem>>, vector<8x256xf32>,
    %c247_i32 = arith.constant 247 : i32
    %112 = tpu.dynamic_rotate %10 by %c247_i32 dim 1 : vector<8x256xf32>, i32 -> vector<8x256xf32>
    %c17 = arith.constant 17 : index
    %c0_62 = arith.constant 0 : index
    %c0_63 = arith.constant 0 : index
    %113 = vector.load %arg5[%c17, %c0_62, %c0_63] : memref<27x1x256xf32, #tpu.memory_space<vmem>>, vector<1x1x256xf32>
    %114 = vector.shape_cast %113 : vector<1x1x256xf32> to vector<1x256xf32>
    %115 = vector.broadcast %114 : vector<1x256xf32> to vector<8x256xf32>
    %116 = arith.mulf %112, %115 : vector<8x256xf32>
    %c136 = arith.constant 136 : index
    %c0_64 = arith.constant 0 : index
    %117 = vector.load %arg10[%c136, %c0_64] : memref<216x256xf32, #tpu.memory_space<vmem>>, vector<8x256xf32>
    tpu.vector_store %arg10[%c136, %c0_64], %116 {strides = array<i32>} : memref<216x256xf32, #tpu.memory_space<vmem>>, vector<8x256xf32>,
    %c201_i32 = arith.constant 201 : i32
    %118 = tpu.dynamic_rotate %10 by %c201_i32 dim 1 : vector<8x256xf32>, i32 -> vector<8x256xf32>
    %c18 = arith.constant 18 : index
    %c0_65 = arith.constant 0 : index
    %c0_66 = arith.constant 0 : index
    %119 = vector.load %arg5[%c18, %c0_65, %c0_66] : memref<27x1x256xf32, #tpu.memory_space<vmem>>, vector<1x1x256xf32>
    %120 = vector.shape_cast %119 : vector<1x1x256xf32> to vector<1x256xf32>
    %121 = vector.broadcast %120 : vector<1x256xf32> to vector<8x256xf32>
    %122 = arith.mulf %118, %121 : vector<8x256xf32>
    %c144 = arith.constant 144 : index
    %c0_67 = arith.constant 0 : index
    %123 = vector.load %arg10[%c144, %c0_67] : memref<216x256xf32, #tpu.memory_space<vmem>>, vector<8x256xf32>
    tpu.vector_store %arg10[%c144, %c0_67], %122 {strides = array<i32>} : memref<216x256xf32, #tpu.memory_space<vmem>>, vector<8x256xf32>,
    %c200_i32 = arith.constant 200 : i32
    %124 = tpu.dynamic_rotate %10 by %c200_i32 dim 1 : vector<8x256xf32>, i32 -> vector<8x256xf32>
    %c19 = arith.constant 19 : index
    %c0_68 = arith.constant 0 : index
    %c0_69 = arith.constant 0 : index
    %125 = vector.load %arg5[%c19, %c0_68, %c0_69] : memref<27x1x256xf32, #tpu.memory_space<vmem>>, vector<1x1x256xf32>
    %126 = vector.shape_cast %125 : vector<1x1x256xf32> to vector<1x256xf32>
    %127 = vector.broadcast %126 : vector<1x256xf32> to vector<8x256xf32>
    %128 = arith.mulf %124, %127 : vector<8x256xf32>
    %c152 = arith.constant 152 : index
    %c0_70 = arith.constant 0 : index
    %129 = vector.load %arg10[%c152, %c0_70] : memref<216x256xf32, #tpu.memory_space<vmem>>, vector<8x256xf32>
    tpu.vector_store %arg10[%c152, %c0_70], %128 {strides = array<i32>} : memref<216x256xf32, #tpu.memory_space<vmem>>, vector<8x256xf32>,
    %c199_i32 = arith.constant 199 : i32
    %130 = tpu.dynamic_rotate %10 by %c199_i32 dim 1 : vector<8x256xf32>, i32 -> vector<8x256xf32>
    %c20 = arith.constant 20 : index
    %c0_71 = arith.constant 0 : index
    %c0_72 = arith.constant 0 : index
    %131 = vector.load %arg5[%c20, %c0_71, %c0_72] : memref<27x1x256xf32, #tpu.memory_space<vmem>>, vector<1x1x256xf32>
    %132 = vector.shape_cast %131 : vector<1x1x256xf32> to vector<1x256xf32>
    %133 = vector.broadcast %132 : vector<1x256xf32> to vector<8x256xf32>
    %134 = arith.mulf %130, %133 : vector<8x256xf32>
    %c160 = arith.constant 160 : index
    %c0_73 = arith.constant 0 : index
    %135 = vector.load %arg10[%c160, %c0_73] : memref<216x256xf32, #tpu.memory_space<vmem>>, vector<8x256xf32>
    tpu.vector_store %arg10[%c160, %c0_73], %134 {strides = array<i32>} : memref<216x256xf32, #tpu.memory_space<vmem>>, vector<8x256xf32>,
    %c193_i32 = arith.constant 193 : i32
    %136 = tpu.dynamic_rotate %10 by %c193_i32 dim 1 : vector<8x256xf32>, i32 -> vector<8x256xf32>
    %c21 = arith.constant 21 : index
    %c0_74 = arith.constant 0 : index
    %c0_75 = arith.constant 0 : index
    %137 = vector.load %arg5[%c21, %c0_74, %c0_75] : memref<27x1x256xf32, #tpu.memory_space<vmem>>, vector<1x1x256xf32>
    %138 = vector.shape_cast %137 : vector<1x1x256xf32> to vector<1x256xf32>
    %139 = vector.broadcast %138 : vector<1x256xf32> to vector<8x256xf32>
    %140 = arith.mulf %136, %139 : vector<8x256xf32>
    %c168 = arith.constant 168 : index
    %c0_76 = arith.constant 0 : index
    %141 = vector.load %arg10[%c168, %c0_76] : memref<216x256xf32, #tpu.memory_space<vmem>>, vector<8x256xf32>
    tpu.vector_store %arg10[%c168, %c0_76], %140 {strides = array<i32>} : memref<216x256xf32, #tpu.memory_space<vmem>>, vector<8x256xf32>,
    %c192_i32 = arith.constant 192 : i32
    %142 = tpu.dynamic_rotate %10 by %c192_i32 dim 1 : vector<8x256xf32>, i32 -> vector<8x256xf32>
    %c22 = arith.constant 22 : index
    %c0_77 = arith.constant 0 : index
    %c0_78 = arith.constant 0 : index
    %143 = vector.load %arg5[%c22, %c0_77, %c0_78] : memref<27x1x256xf32, #tpu.memory_space<vmem>>, vector<1x1x256xf32>
    %144 = vector.shape_cast %143 : vector<1x1x256xf32> to vector<1x256xf32>
    %145 = vector.broadcast %144 : vector<1x256xf32> to vector<8x256xf32>
    %146 = arith.mulf %142, %145 : vector<8x256xf32>
    %c176 = arith.constant 176 : index
    %c0_79 = arith.constant 0 : index
    %147 = vector.load %arg10[%c176, %c0_79] : memref<216x256xf32, #tpu.memory_space<vmem>>, vector<8x256xf32>
    tpu.vector_store %arg10[%c176, %c0_79], %146 {strides = array<i32>} : memref<216x256xf32, #tpu.memory_space<vmem>>, vector<8x256xf32>,
    %c191_i32 = arith.constant 191 : i32
    %148 = tpu.dynamic_rotate %10 by %c191_i32 dim 1 : vector<8x256xf32>, i32 -> vector<8x256xf32>
    %c23 = arith.constant 23 : index
    %c0_80 = arith.constant 0 : index
    %c0_81 = arith.constant 0 : index
    %149 = vector.load %arg5[%c23, %c0_80, %c0_81] : memref<27x1x256xf32, #tpu.memory_space<vmem>>, vector<1x1x256xf32>
    %150 = vector.shape_cast %149 : vector<1x1x256xf32> to vector<1x256xf32>
    %151 = vector.broadcast %150 : vector<1x256xf32> to vector<8x256xf32>
    %152 = arith.mulf %148, %151 : vector<8x256xf32>
    %c184 = arith.constant 184 : index
    %c0_82 = arith.constant 0 : index
    %153 = vector.load %arg10[%c184, %c0_82] : memref<216x256xf32, #tpu.memory_space<vmem>>, vector<8x256xf32>
    tpu.vector_store %arg10[%c184, %c0_82], %152 {strides = array<i32>} : memref<216x256xf32, #tpu.memory_space<vmem>>, vector<8x256xf32>,
    %c185_i32 = arith.constant 185 : i32
    %154 = tpu.dynamic_rotate %10 by %c185_i32 dim 1 : vector<8x256xf32>, i32 -> vector<8x256xf32>
    %c24_83 = arith.constant 24 : index
    %c0_84 = arith.constant 0 : index
    %c0_85 = arith.constant 0 : index
    %155 = vector.load %arg5[%c24_83, %c0_84, %c0_85] : memref<27x1x256xf32, #tpu.memory_space<vmem>>, vector<1x1x256xf32>
    %156 = vector.shape_cast %155 : vector<1x1x256xf32> to vector<1x256xf32>
    %157 = vector.broadcast %156 : vector<1x256xf32> to vector<8x256xf32>
    %158 = arith.mulf %154, %157 : vector<8x256xf32>
    %c192 = arith.constant 192 : index
    %c0_86 = arith.constant 0 : index
    %159 = vector.load %arg10[%c192, %c0_86] : memref<216x256xf32, #tpu.memory_space<vmem>>, vector<8x256xf32>
    tpu.vector_store %arg10[%c192, %c0_86], %158 {strides = array<i32>} : memref<216x256xf32, #tpu.memory_space<vmem>>, vector<8x256xf32>,
    %c184_i32 = arith.constant 184 : i32
    %160 = tpu.dynamic_rotate %10 by %c184_i32 dim 1 : vector<8x256xf32>, i32 -> vector<8x256xf32>
    %c25 = arith.constant 25 : index
    %c0_87 = arith.constant 0 : index
    %c0_88 = arith.constant 0 : index
    %161 = vector.load %arg5[%c25, %c0_87, %c0_88] : memref<27x1x256xf32, #tpu.memory_space<vmem>>, vector<1x1x256xf32>
    %162 = vector.shape_cast %161 : vector<1x1x256xf32> to vector<1x256xf32>
    %163 = vector.broadcast %162 : vector<1x256xf32> to vector<8x256xf32>
    %164 = arith.mulf %160, %163 : vector<8x256xf32>
    %c200 = arith.constant 200 : index
    %c0_89 = arith.constant 0 : index
    %165 = vector.load %arg10[%c200, %c0_89] : memref<216x256xf32, #tpu.memory_space<vmem>>, vector<8x256xf32>
    tpu.vector_store %arg10[%c200, %c0_89], %164 {strides = array<i32>} : memref<216x256xf32, #tpu.memory_space<vmem>>, vector<8x256xf32>,
    %c183_i32 = arith.constant 183 : i32
    %166 = tpu.dynamic_rotate %10 by %c183_i32 dim 1 : vector<8x256xf32>, i32 -> vector<8x256xf32>
    %c26 = arith.constant 26 : index
    %c0_90 = arith.constant 0 : index
    %c0_91 = arith.constant 0 : index
    %167 = vector.load %arg5[%c26, %c0_90, %c0_91] : memref<27x1x256xf32, #tpu.memory_space<vmem>>, vector<1x1x256xf32>
    %168 = vector.shape_cast %167 : vector<1x1x256xf32> to vector<1x256xf32>
    %169 = vector.broadcast %168 : vector<1x256xf32> to vector<8x256xf32>
    %170 = arith.mulf %166, %169 : vector<8x256xf32>
    %c208 = arith.constant 208 : index
    %c0_92 = arith.constant 0 : index
    %171 = vector.load %arg10[%c208, %c0_92] : memref<216x256xf32, #tpu.memory_space<vmem>>, vector<8x256xf32>
    tpu.vector_store %arg10[%c208, %c0_92], %170 {strides = array<i32>} : memref<216x256xf32, #tpu.memory_space<vmem>>, vector<8x256xf32>,
    %c0_93 = arith.constant 0 : index
    %c0_94 = arith.constant 0 : index
    %172 = vector.load %arg3[%c0_93, %c0_94] : memref<8x216xf32, #tpu.memory_space<vmem>>, vector<8x216xf32>
    %173 = arith.truncf %172 : vector<8x216xf32> to vector<8x216xbf16>
    %c0_95 = arith.constant 0 : index
    %c0_96 = arith.constant 0 : index
    %174 = vector.load %arg10[%c0_95, %c0_96] : memref<216x256xf32, #tpu.memory_space<vmem>>, vector<216x256xf32>
    %175 = arith.truncf %174 : vector<216x256xf32> to vector<216x256xbf16>
    %cst_97 = arith.constant dense<0.000000e+00> : vector<8x256xf32>
    %176 = tpu.matmul %173, %175, %cst_97 {dimension_numbers = #tpu.dot_dimension_numbers<[1], [0], [0], [1], [0, 0, 1, 1], [], []>} : vector<8x216xbf16>, vector<216x256xbf16>, vector<8x256xf32> -> vector<8x256xf32>
    %c0_98 = arith.constant 0 : index
    %c0_99 = arith.constant 0 : index
    %177 = vector.load %arg7[%c0_98, %c0_99] : memref<8x1xf32, #tpu.memory_space<vmem>>, vector<8x1xf32>
    %178 = vector.broadcast %177 : vector<8x1xf32> to vector<8x256xf32>
    %179 = arith.addf %176, %178 : vector<8x256xf32>
    %cst_100 = arith.constant 0.000000e+00 : f32
    %180 = vector.broadcast %cst_100 : f32 to vector<8x256xf32>
    %181 = arith.maximumf %179, %180 : vector<8x256xf32>
    %c0_101 = arith.constant 0 : index
    %c0_102 = arith.constant 0 : index
    %182 = vector.load %arg4[%c0_101, %c0_102] : memref<16x8xf32, #tpu.memory_space<vmem>>, vector<16x8xf32>
    %183 = arith.truncf %182 : vector<16x8xf32> to vector<16x8xbf16>
    %184 = arith.truncf %181 : vector<8x256xf32> to vector<8x256xbf16>
    %cst_103 = arith.constant dense<0.000000e+00> : vector<16x256xf32>
    %185 = tpu.matmul %183, %184, %cst_103 {dimension_numbers = #tpu.dot_dimension_numbers<[1], [0], [0], [1], [0, 0, 1, 1], [], []>} : vector<16x8xbf16>, vector<8x256xbf16>, vector<16x256xf32> -> vector<16x256xf32>
    %c0_104 = arith.constant 0 : index
    %c0_105 = arith.constant 0 : index
    %186 = vector.load %arg8[%c0_104, %c0_105] : memref<16x1xf32, #tpu.memory_space<vmem>>, vector<16x1xf32>
    %187 = vector.broadcast %186 : vector<16x1xf32> to vector<16x256xf32>
    %188 = arith.addf %185, %187 : vector<16x256xf32>
    %189 = arith.addf %188, %1 : vector<16x256xf32>
    %cst_106 = arith.constant 0.000000e+00 : f32
    %190 = vector.broadcast %cst_106 : f32 to vector<16x256xf32>
    %191 = arith.maximumf %189, %190 : vector<16x256xf32>
    %c0_107 = arith.constant 0 : index
    %c0_108 = arith.constant 0 : index
    %c0_109 = arith.constant 0 : index
    %192 = vector.load %arg9[%c0_107, %c0_108, %c0_109] : memref<1x16x256xf32, #tpu.memory_space<vmem>>, vector<1x16x256xf32>
    %193 = vector.shape_cast %192 : vector<1x16x256xf32> to vector<16x256xf32>
    %194 = vector.shape_cast %191 : vector<16x256xf32> to vector<1x16x256xf32>
    tpu.vector_store %arg9[%c0_107, %c0_108, %c0_109], %194 {strides = array<i32>} : memref<1x16x256xf32, #tpu.memory_space<vmem>>, vector<1x16x256xf32>,
    return
  }
  func.func @transform_0(%arg0: i32) -> (i32, i32, i32) {
    %c0_i32 = arith.constant 0 : i32
    %c0_i32_0 = arith.constant 0 : i32
    %c0_i32_1 = arith.constant 0 : i32
    return %arg0, %c0_i32, %c0_i32_0 : i32, i32, i32
  }
  func.func @transform_1(%arg0: i32) -> (i32, i32) {
    %c0_i32 = arith.constant 0 : i32
    %c0_i32_0 = arith.constant 0 : i32
    %c0_i32_1 = arith.constant 0 : i32
    return %c0_i32, %c0_i32_0 : i32, i32
  }
  func.func @transform_2(%arg0: i32) -> (i32, i32) {
    %c0_i32 = arith.constant 0 : i32
    %c0_i32_0 = arith.constant 0 : i32
    %c0_i32_1 = arith.constant 0 : i32
    return %c0_i32, %c0_i32_0 : i32, i32
  }
  func.func @transform_3(%arg0: i32) -> (i32, i32) {
    %c0_i32 = arith.constant 0 : i32
    %c0_i32_0 = arith.constant 0 : i32
    %c0_i32_1 = arith.constant 0 : i32
    return %c0_i32, %c0_i32_0 : i32, i32
  }
  func.func @transform_4(%arg0: i32) -> (i32, i32, i32) {
    %c0_i32 = arith.constant 0 : i32
    %c0_i32_0 = arith.constant 0 : i32
    %c0_i32_1 = arith.constant 0 : i32
    %c0_i32_2 = arith.constant 0 : i32
    return %c0_i32, %c0_i32_0, %c0_i32_1 : i32, i32, i32
  }
  func.func @transform_5(%arg0: i32) -> (i32, i32) {
    %c0_i32 = arith.constant 0 : i32
    %c0_i32_0 = arith.constant 0 : i32
    %c0_i32_1 = arith.constant 0 : i32
    return %c0_i32, %c0_i32_0 : i32, i32
  }
  func.func @transform_6(%arg0: i32) -> (i32, i32) {
    %c0_i32 = arith.constant 0 : i32
    %c0_i32_0 = arith.constant 0 : i32
    %c0_i32_1 = arith.constant 0 : i32
    return %c0_i32, %c0_i32_0 : i32, i32
  }
  func.func @transform_7(%arg0: i32) -> (i32, i32) {
    %c0_i32 = arith.constant 0 : i32
    %c0_i32_0 = arith.constant 0 : i32
    %c0_i32_1 = arith.constant 0 : i32
    return %c0_i32, %c0_i32_0 : i32, i32
  }
  func.func @transform_8(%arg0: i32) -> (i32, i32, i32) {
    %c0_i32 = arith.constant 0 : i32
    %c0_i32_0 = arith.constant 0 : i32
    %c0_i32_1 = arith.constant 0 : i32
    return %arg0, %c0_i32, %c0_i32_0 : i32, i32, i32
  }
}

</mosaic_0001>

<bundles_post_ra>
// kernel: bottleneck_forward.1
= control target key start
LH: loop header
LB: loop body
LE: loop exit
PB: predicated region body
PF: predicated region fallthrough
CT: control target
= control target key end

     0   :  { %s1373_s27 = smov 0   ;;  %s1822_s0 = inlined_call_operand.vmem [shape: f32[2,16,256], index: 0, kind: input, shape index: {}]   ;;  %s1823_s1 = inlined_call_operand.vmem [shape: f32[8,16], index: 1, kind: input, shape index: {}]   ;;  %s1824_s2 = inlined_call_operand.vmem [shape: f32[8,216], index: 2, kind: input, shape index: {}]   ;;  %s1825_s3 = inlined_call_operand.vmem [shape: f32[16,8], index: 3, kind: input, shape index: {}]   ;;  %s1826_s4 = inlined_call_operand.vmem [shape: f32[27,1,256], index: 4, kind: input, shape index: {}]   ;;  %s1827_s5 = inlined_call_operand.vmem [shape: f32[8,1], index: 5, kind: input, shape index: {}]   ;;  %s1828_s6 = inlined_call_operand.vmem [shape: f32[8,1], index: 6, kind: input, shape index: {}]   ;;  %s1829_s7 = inlined_call_operand.vmem [shape: f32[16,1], index: 7, kind: input, shape index: {}]   ;;  %s1830_s8 = inlined_call_operand.vmem [shape: f32[2,16,256], index: 8, kind: output, shape index: {}]  }
   0x1 LB: > { %s1230_s28 = sadd.s32 4294967295, %s1308_s27   ;;  %p1234_p0 = scmp.ge.s32.totalorder %s1308_s27, 1  ;;  %s1308_s27 = sphi %s1373_s27, %s18_s27  }
   0x2   : > { %p262_p1 = scmp.lt.s32.totalorder %s1308_s27, 3 }
   0x4   : > { %p263_p2 = pnand %p1234_p0, %p262_p1 }
   0x5   : > { %p296_p3 = scmp.lt.s32.totalorder (!%p263_p2), %s1230_s28, 1  ;;  %v315_v0 = vld [vmem:[%s1827_s5] sm:$0xff] (!%p263_p2)  ;;  %v1310_v1 = vmov (!%p263_p2), 0   ;;  %vm321_vm0 = vcmask (!%p263_p2), 130048   ;;  %s1311_s15 = smov (!%p263_p2), 72   ;;  %v948_v20 = vld [vmem:[%s1824_s2 + $0x8] sm:$0xff] (!%p263_p2)  ;;  %v372_v34 = vlaneseq (!%p263_p2) }
   0x6   : > { %266 = sbr.rel (%p263_p2) target bundleno = 892 (0x37c), region = 52  ;;  %357 = vmatprep.mubr.bf16.mxu0 (!%p263_p2), %v1310_v1  ;;  %1300 = vset.pattern.permute.xlu0 (!%p263_p2), %v1310_v1  ;;  %v311_v2 = vld [vmem:[%s1823_s1] sm:$0xff] (!%p263_p2)  ;;  %s1312_s16 = smov (!%p263_p2), 73   ;;  %v950_v21 = vpack.c.bf16 (!%p263_p2), %v948_v20, %v948_v20  ;;  %vm1039_vm1 = vcmask (!%p263_p2), 719872   ;;  %v1099_v23 = vld [vmem:[%s1829_s7 + $0x8] sm:$0xff] (!%p263_p2) }
   0x7   : > { %318 = vperm.xlu0 (!%p263_p2), %1300, %v315_v0   ;;  %1301 = vset.pattern.permute.xlu1 (!%p263_p2), %v1310_v1  ;;  %v312_v9 = vpack.c.bf16 (!%p263_p2), %v311_v2, %v311_v2  ;;  %s1313_s17 = smov (!%p263_p2), 71   ;;  %s1314_s18 = smov (!%p263_p2), 65   ;;  %v1098_v19 = vld [vmem:[%s1829_s7] sm:$0xff] (!%p263_p2)  ;;  %v380_v37 = vshrl.u32 (!%p263_p2), %v372_v34, 7  ;;  %v1469_v40 = vand.u32 (!%p263_p2), 127, %v372_v34 }
   0x8   : > { %s1315_s19 = smov (!%p263_p2), 64   ;;  %s1316_s20 = smov (!%p263_p2), 63   ;;  %1267 = vmatprep.mubr.msk.bf16.mxu1 (!%p263_p2), %vm1039_vm1, %v950_v21  ;;  %v1033_v22 = vld [vmem:[%s1828_s6] sm:$0xff] (!%p263_p2)  ;;  %v1244_v59 = vld [vmem:[%s1826_s4 + $0xa] sm:$0x3] (!%p263_p2) }
   0x9   : > { %s1317_s21 = smov (!%p263_p2), 57   ;;  %s1318_s22 = smov (!%p263_p2), 56   ;;  %v377_v41 = vld [vmem:[%s1826_s4] sm:$0x3] (!%p263_p2)  ;;  %v1474_v42 = vsub.s32 (!%p263_p2), 0, %v380_v37  ;;  %v1483_v46 = vsub.s32 (!%p263_p2), 1, %v380_v37 }
   0xa   : > { %s1319_s23 = smov (!%p263_p2), 55   ;;  %s1320_s24 = smov (!%p263_p2), 9   ;;  %v1240_v43 = vld [vmem:[%s1826_s4 + $0x2] sm:$0x3] (!%p263_p2)  ;;  %vm397_vm2 = vcmp.lt.s32.totalorder (!%p263_p2), %v1469_v40, 72  ;;  %vm445_vm3 = vcmp.lt.s32.totalorder (!%p263_p2), %v1469_v40, 65 }
   0xb   : > { %s1321_s25 = smov (!%p263_p2), 8   ;;  %s1322_s26 = smov (!%p263_p2), 7   ;;  %v1242_v47 = vld [vmem:[%s1826_s4 + $0x6] sm:$0x3] (!%p263_p2)  ;;  %vm374_vm4 = vcmp.lt.s32.totalorder (!%p263_p2), %v1469_v40, 73  ;;  %v382_v48 = vrot.slane (!%p263_p2), %v377_v41, %v1474_v42  ;;  %v406_v49 = vrot.slane (!%p263_p2), %v1240_v43, %v1474_v42  ;;  %v386_v51 = vrot.slane (!%p263_p2), %v377_v41, %v1483_v46 }
   0xc   : > { %s1323_s29 = smov (!%p263_p2), 1   ;;  %s1324_s30 = smov (!%p263_p2), 127   ;;  %v1241_v50 = vld [vmem:[%s1826_s4 + $0x4] sm:$0x3] (!%p263_p2)  ;;  %vm421_vm5 = vcmp.lt.s32.totalorder (!%p263_p2), %v1469_v40, 71  ;;  %v458_v53 = vrot.slane (!%p263_p2), %v1242_v47, %v1483_v46  ;;  %v410_v56 = vrot.slane (!%p263_p2), %v1240_v43, %v1483_v46  ;;  %v454_v63 = vrot.slane (!%p263_p2), %v1242_v47, %v1474_v42 }
   0xd   : > { %s1832_s28 = smov (!%p296_p3, %s1230_s28), 1  ;;  %s1325_s10 = smov 121   ;;  %v434_v62 = vrot.slane %v1241_v50, %v1483_v46  ;;  %v1243_v0 = vld [vmem:[%s1826_s4 + $0x8] sm:$0x3]  ;;  %vm493_vm6 = vcmp.lt.s32.totalorder %v1469_v40, 63  ;;  %vm469_vm7 = vcmp.lt.s32.totalorder %v1469_v40, 64 }
   0xe   : > { %s1272_s9 = sshll.u32 %s1832_s28, 5  ;;  %s1326_s11 = smov 120   ;;  %v1246_v20 = vld [vmem:[%s1826_s4 + $0xe] sm:$0x3]  ;;  %vm541_vm8 = vcmp.lt.s32.totalorder %v1469_v40, 56  ;;  %vm517_vm9 = vcmp.lt.s32.totalorder %v1469_v40, 57 }
   0xf   : > { %s300_s12 = scalar_lea.vmem %s1822_s0, %s1272_s9  ;;  %v554_v34 = vrot.slane %v1246_v20, %v1483_v46  ;;  %vm589_vm10 = vcmp.lt.s32.totalorder %v1469_v40, 9  ;;  %vm565_vm11 = vcmp.lt.s32.totalorder %v1469_v40, 55  ;;  %vm637_vm12 = vcmp.lt.s32.totalorder %v1469_v40, 7 }
  0x10   : > { %v1395_v3 = vld [vmem:[%s300_s12 + $0x8] sm:$0xff]  ;;  %v1397_v4 = vld [vmem:[%s300_s12 + $0x18] sm:$0xff]  ;;  %v1399_v5 = vld [vmem:[%s300_s12] sm:$0xff]  ;;  %vm613_vm13 = vcmp.lt.s32.totalorder %v1469_v40, 8  ;;  %vm661_vm14 = vcmp.lt.s32.totalorder %v1469_v40, 1  ;;  %vm726_vm15 = vcmp.lt.s32.totalorder %v1469_v40, 121 }
  0x11   : > { %v314_v6 = vpack.c.bf16 %v1397_v4, %v1395_v3  ;;  %v1403_v7 = vld [vmem:[%s300_s12 + $0x10] sm:$0xff]  ;;  %s1327_s12 = smov 119   ;;  %vm750_vm1 = vcmp.lt.s32.totalorder %v1469_v40, 120 }
  0x12   : > { %v313_v8 = vpack.c.bf16 %v1403_v7, %v1399_v5 }
  0x13   : > { %325 = vmatprep.subr.bf16.mxu0 %v314_v6 }
  0x14   : > { %326 = vmatpush1.bf16.msra.mxu0 %v313_v8 }
  0x17   : > { %1239 = vmatmul.mubr.msk.bf16.vlgmr.msra.gmra.mrb[0].mxu0 %vm321_vm0, %v312_v9  ;;  %vm702_vm0 = vcmp.lt.s32.totalorder %v1469_v40, 127 }
  0x18   : > { %1152 = vmatprep.mubr.bf16.mxu0 %v1310_v1 }
  0x86   : > { %v319_v10 = vpop.permute.xlu0 %318 }
  0xea   : > { %v359_v11 = vpop.f32.mrb[0].mxu0 }
  0xeb   : > { %v360_v12 = vadd.f32 %v359_v11, %v319_v10  ;;  %v361_v13 = vpop.f32.mrb[1].mxu0  ;;  %v506_v11 = vrot.slane %v1244_v59, %v1483_v46 }
  0xec   : > { %v363_v14 = vpop.f32.mrb[2].mxu0  ;;  %v362_v16 = vadd.f32 %v361_v13, %v319_v10 }
  0xed   : > { %v1407_v15 = vmax.f32 %v360_v12, 0.0  ;;  %v364_v17 = vpop.f32.mrb[3].mxu0 }
  0xee   : > { %v1411_v18 = vmax.f32 %v362_v16, 0.0  ;;  %v430_v16 = vrot.slane %v1241_v50, %v1474_v42  ;;  %v482_v17 = vrot.slane %v1243_v0, %v1483_v46 }
  0xef   : > { %393 = vrot.lane.b32.xlu1 %v1407_v15, %s1311_s15  ;;  %368 = vrot.lane.b32.xlu0 %v1407_v15, %s1312_s16 }
  0xf3   : > { %417 = vrot.lane.b32.xlu1 %v1407_v15, %s1313_s17  ;;  %395 = vrot.lane.b32.xlu0 %v1411_v18, %s1311_s15 }
  0xf7   : > { %441 = vrot.lane.b32.xlu1 %v1407_v15, %s1314_s18  ;;  %419 = vrot.lane.b32.xlu0 %v1411_v18, %s1313_s17 }
  0xfb   : > { %465 = vrot.lane.b32.xlu1 %v1407_v15, %s1315_s19  ;;  %443 = vrot.lane.b32.xlu0 %v1411_v18, %s1314_s18 }
  0xff   : > { %489 = vrot.lane.b32.xlu1 %v1407_v15, %s1316_s20  ;;  %467 = vrot.lane.b32.xlu0 %v1411_v18, %s1315_s19 }
 0x103   : > { %513 = vrot.lane.b32.xlu1 %v1407_v15, %s1317_s21  ;;  %491 = vrot.lane.b32.xlu0 %v1411_v18, %s1316_s20 }
 0x107   : > { %537 = vrot.lane.b32.xlu1 %v1407_v15, %s1318_s22  ;;  %515 = vrot.lane.b32.xlu0 %v1411_v18, %s1317_s21 }
 0x10b   : > { %561 = vrot.lane.b32.xlu1 %v1407_v15, %s1319_s23  ;;  %539 = vrot.lane.b32.xlu0 %v1411_v18, %s1318_s22 }
 0x10f   : > { %370 = vrot.lane.b32.xlu1 %v1411_v18, %s1312_s16  ;;  %563 = vrot.lane.b32.xlu0 %v1411_v18, %s1319_s23 }
 0x113   : > { %585 = vrot.lane.b32.xlu1 %v1407_v15, %s1320_s24  ;;  %587 = vrot.lane.b32.xlu0 %v1411_v18, %s1320_s24 }
 0x117   : > { %609 = vrot.lane.b32.xlu1 %v1407_v15, %s1321_s25  ;;  %611 = vrot.lane.b32.xlu0 %v1411_v18, %s1321_s25 }
 0x11b   : > { %633 = vrot.lane.b32.xlu1 %v1407_v15, %s1322_s26  ;;  %635 = vrot.lane.b32.xlu0 %v1411_v18, %s1322_s26  ;;  %s305_s26 = scalar_lea.vmem %s1830_s8, %s1272_s9 }
 0x11f   : > { %657 = vrot.lane.b32.xlu1 %v1407_v15, %s1323_s29  ;;  %659 = vrot.lane.b32.xlu0 %v1411_v18, %s1323_s29 }
 0x123   : > { %698 = vrot.lane.b32.xlu1 %v1407_v15, %s1324_s30  ;;  %700 = vrot.lane.b32.xlu0 %v1411_v18, %s1324_s30 }
 0x127   : > { %722 = vrot.lane.b32.xlu1 %v1407_v15, %s1325_s10  ;;  %724 = vrot.lane.b32.xlu0 %v1411_v18, %s1325_s10 }
 0x12b   : > { %746 = vrot.lane.b32.xlu1 %v1407_v15, %s1326_s11  ;;  %748 = vrot.lane.b32.xlu0 %v1411_v18, %s1326_s11 }
 0x12f   : > { %770 = vrot.lane.b32.xlu1 %v1407_v15, %s1327_s12  ;;  %772 = vrot.lane.b32.xlu0 %v1411_v18, %s1327_s12 }
 0x133   : > { %1102 = vperm.xlu0 %1300, %v1098_v19   ;;  %1036 = vperm.xlu1 %1301, %v1033_v22  }
 0x137   : > { %1107 = vperm.xlu1 %1301, %v1099_v23  }
 0x161   : > { %v394_v24 = vpop.permute.xlu1 %393  ;;  %v369_v25 = vpop.permute.xlu0 %368 }
 0x165   : > { %v418_v26 = vpop.permute.xlu1 %417  ;;  %v396_v27 = vpop.permute.xlu0 %395 }
 0x166   : > { %v1497_v52 = vsel %vm397_vm2, %v396_v27, %v394_v24  ;;  %v1504_v57 = vsel %vm397_vm2, %v394_v24, %v396_v27  ;;  %v1245_v24 = vld [vmem:[%s1826_s4 + $0xc] sm:$0x3]  ;;  %vm774_vm2 = vcmp.lt.s32.totalorder %v1469_v40, 119 }
 0x167   : > { %v413_v2 = vmul.f32 %v406_v49, %v1497_v52  ;;  %v414_v14 = vmul.f32 %v410_v56, %v1504_v57  ;;  %v530_v49 = vrot.slane %v1245_v24, %v1483_v46 }
 0x169   : > { %v442_v28 = vpop.permute.xlu1 %441  ;;  %v420_v29 = vpop.permute.xlu0 %419 }
 0x16a   : > { %v1527_v6 = vsel %vm421_vm5, %v418_v26, %v420_v29  ;;  %v1552_v22 = vsel %vm421_vm5, %v420_v29, %v418_v26  ;;  %v502_v26 = vrot.slane %v1244_v59, %v1474_v42 }
 0x16b   : > { %v438_v23 = vmul.f32 %v434_v62, %v1527_v6  ;;  %v437_v47 = vmul.f32 %v430_v16, %v1552_v22 }
 0x16d   : > { %v1457_v30 = vpop.permute.xlu1 %465  ;;  %v444_v31 = vpop.permute.xlu0 %443 }
 0x16e   : > { %v1508_v58 = vsel %vm445_vm3, %v442_v28, %v444_v31  ;;  %v1533_v9 = vsel %vm445_vm3, %v444_v31, %v442_v28  ;;  %vm1043_vm3 = vcmask 1043456  }
 0x16f   : > { %v462_v10 = vmul.f32 %v458_v53, %v1508_v58  ;;  %v461_v27 = vmul.f32 %v454_v63, %v1533_v9  ;;  %v550_v53 = vrot.slane %v1246_v20, %v1474_v42 }
 0x171   : > { %v1459_v32 = vpop.permute.xlu1 %489  ;;  %v1461_v33 = vpop.permute.xlu0 %467  ;;  %v1008_v41 = vpack.c.bf16 %v462_v10, %v438_v23  ;;  %v526_v10 = vrot.slane %v1245_v24, %v1474_v42 }
 0x172   : > { %v1564_v28 = vsel %vm469_vm7, %v1457_v30, %v1461_v33  ;;  %v1595_v50 = vsel %vm469_vm7, %v1461_v33, %v1457_v30  ;;  %v1007_v30 = vpack.c.bf16 %v461_v27, %v437_v47 }
 0x175   : > { %v1463_v35 = vpop.permute.xlu1 %513  ;;  %v492_v36 = vpop.permute.xlu0 %491 }
 0x176   : > { %v1545_v19 = vsel %vm493_vm6, %v1459_v32, %v492_v36  ;;  %v1571_v29 = vsel %vm493_vm6, %v492_v36, %v1459_v32  ;;  %v1248_v36 = vld [vmem:[%s1826_s4 + $0x12] sm:$0x3] }
 0x177   : > { %v510_v31 = vmul.f32 %v506_v11, %v1545_v19  ;;  %v509_v56 = vmul.f32 %v502_v26, %v1571_v29  ;;  %v602_v63 = vrot.slane %v1248_v36, %v1483_v46 }
 0x179   : > { %v1465_v38 = vpop.permute.xlu1 %537  ;;  %v1467_v39 = vpop.permute.xlu0 %515 }
 0x17a   : > { %v1608_v59 = vsel %vm517_vm9, %v1463_v35, %v1467_v39 }
 0x17b   : > { %v534_v16 = vmul.f32 %v530_v49, %v1608_v59 }
 0x17d   : > { %v1479_v44 = vpop.permute.xlu1 %561  ;;  %v1481_v45 = vpop.permute.xlu0 %539 }
 0x17e   : > { %v1586_v32 = vsel %vm541_vm8, %v1465_v38, %v1481_v45  ;;  %v1615_v33 = vsel %vm541_vm8, %v1481_v45, %v1465_v38  ;;  %v1250_v38 = vld [vmem:[%s1826_s4 + $0x16] sm:$0x3]  ;;  %v1632_v45 = vsel %vm517_vm9, %v1467_v39, %v1463_v35  ;;  %v1249_v35 = vld [vmem:[%s1826_s4 + $0x14] sm:$0x3] }
 0x17f   : > { %v558_v62 = vmul.f32 %v554_v34, %v1586_v32  ;;  %v557_v20 = vmul.f32 %v550_v53, %v1615_v33  ;;  %v533_v34 = vmul.f32 %v526_v10, %v1632_v45  ;;  %v626_v49 = vrot.slane %v1249_v35, %v1483_v46 }
 0x180   : > { %v646_v53 = vrot.slane %v1250_v38, %v1474_v42  ;;  %v622_v10 = vrot.slane %v1249_v35, %v1474_v42 }
 0x181   : > { %v371_v54 = vpop.permute.xlu1 %370  ;;  %v1501_v55 = vpop.permute.xlu0 %563  ;;  %v1012_v26 = vpack.c.bf16 %v558_v62, %v534_v16 }
 0x182   : > { %v1513_v60 = vsel %vm374_vm4, %v369_v25, %v371_v54  ;;  %v1515_v61 = vsel %vm374_vm4, %v371_v54, %v369_v25  ;;  %v1247_v54 = vld [vmem:[%s1826_s4 + $0x10] sm:$0x3]  ;;  %vm1110_vm4 = vcmask 64512  }
 0x183   : > { %v389_v1 = vmul.f32 %v382_v48, %v1515_v61  ;;  %v390_v8 = vmul.f32 %v386_v51, %v1513_v60  ;;  %v478_v48 = vrot.slane %v1243_v0, %v1474_v42  ;;  %v486_v51 = vmul.f32 %v482_v17, %v1564_v28 }
 0x184   : > { %v578_v11 = vrot.slane %v1247_v54, %v1483_v46  ;;  %v598_v17 = vrot.slane %v1248_v36, %v1474_v42 }
 0x185   : > { %v1537_v12 = vpop.permute.xlu1 %585  ;;  %v588_v13 = vpop.permute.xlu0 %587  ;;  %v1005_v21 = vpack.c.bf16 %v413_v2, %v389_v1  ;;  %v1006_v25 = vpack.c.bf16 %v414_v14, %v390_v8  ;;  %v1010_v1 = vpack.c.bf16 %v510_v31, %v486_v51  ;;  %v485_v8 = vmul.f32 %v478_v48, %v1595_v50  ;;  %v1251_v48 = vld [vmem:[%s1826_s4 + $0x18] sm:$0x3] }
 0x186   : > { %v590_v14 = vsel %vm589_vm10, %v1537_v12, %v588_v13  ;;  %v591_v23 = vsel %vm589_vm10, %v588_v13, %v1537_v12  ;;  %v1663_v12 = vsel %vm565_vm11, %v1501_v55, %v1479_v44 }
 0x187   : > { %1050 = vmatprep.subr.bf16.mxu1 %v1006_v25  ;;  %v1009_v39 = vpack.c.bf16 %v509_v56, %v485_v8  ;;  %v606_v24 = vmul.f32 %v602_v63, %v590_v14  ;;  %v650_v25 = vrot.slane %v1250_v38, %v1483_v46  ;;  %v605_v36 = vmul.f32 %v598_v17, %v591_v23  ;;  %v1254_v14 = vld [vmem:[%s1826_s4 + $0x1e] sm:$0x3] }
 0x188   : > { %1051 = vmatpush1.bf16.msra.mxu1 %v1005_v21  ;;  %v1642_v21 = vsel %vm565_vm11, %v1479_v44, %v1501_v55  ;;  %v1252_v44 = vld [vmem:[%s1826_s4 + $0x1a] sm:$0x3]  ;;  %v670_v17 = vrot.slane %v1251_v48, %v1474_v42 }
 0x189   : > { %v1575_v37 = vpop.permute.xlu1 %609  ;;  %v1577_v43 = vpop.permute.xlu0 %611  ;;  %1052 = vmatprep.subr.bf16.mxu1 %v1008_v41  ;;  %v574_v41 = vrot.slane %v1247_v54, %v1474_v42  ;;  %v582_v13 = vmul.f32 %v578_v11, %v1642_v21  ;;  %v1011_v54 = vpack.c.bf16 %v557_v20, %v533_v34  ;;  %v691_v38 = vrot.slane %v1252_v44, %v1483_v46  ;;  %v1253_v20 = vld [vmem:[%s1826_s4 + $0x1c] sm:$0x3] }
 0x18a   : > { %v614_v51 = vsel %vm613_vm13, %v1575_v37, %v1577_v43 }
 0x18b   : > { %v1014_v63 = vpack.c.bf16 %v606_v24, %v582_v13  ;;  %v581_v8 = vmul.f32 %v574_v41, %v1663_v12  ;;  %v739_v24 = vrot.slane %v1254_v14, %v1483_v46  ;;  %v687_v41 = vrot.slane %v1252_v44, %v1474_v42 }
 0x18c   : > { %1053 = vmatpush1.bf16.msra.mxu1 %v1007_v30  ;;  %v674_v30 = vrot.slane %v1251_v48, %v1483_v46  ;;  %v695_v48 = vmul.f32 %v691_v38, %v1411_v18 }
 0x18d   : > { %v634_v0 = vpop.permute.xlu1 %633  ;;  %v636_v2 = vpop.permute.xlu0 %635  ;;  %1054 = vmatprep.subr.bf16.mxu1 %v1010_v1  ;;  %v1013_v35 = vpack.c.bf16 %v605_v36, %v581_v8  ;;  %v694_v8 = vmul.f32 %v687_v41, %v1407_v15 }
 0x18e   : > { %v638_v47 = vsel %vm637_vm12, %v634_v0, %v636_v2  ;;  %v639_v55 = vsel %vm637_vm12, %v636_v2, %v634_v0  ;;  %v615_v0 = vsel %vm613_vm13, %v1577_v43, %v1575_v37  ;;  %v630_v2 = vmul.f32 %v626_v49, %v614_v51  ;;  %v1256_v51 = vld [vmem:[%s1826_s4 + $0x22] sm:$0x3] }
 0x18f   : > { %v654_v56 = vmul.f32 %v650_v25, %v638_v47  ;;  %v653_v16 = vmul.f32 %v646_v53, %v639_v55  ;;  %v715_v47 = vrot.slane %v1253_v20, %v1483_v46  ;;  %v735_v49 = vrot.slane %v1254_v14, %v1474_v42 }
 0x190   : > { %1055 = vmatpush1.bf16.msra.mxu1 %v1009_v39  ;;  %v783_v14 = vrot.slane %v1256_v51, %v1474_v42 }
 0x191   : > { %v658_v27 = vpop.permute.xlu1 %657  ;;  %v660_v31 = vpop.permute.xlu0 %659  ;;  %1056 = vmatprep.subr.bf16.mxu1 %v1012_v26  ;;  %v1016_v23 = vpack.c.bf16 %v654_v56, %v630_v2  ;;  %v629_v26 = vmul.f32 %v622_v10, %v615_v0  ;;  %v1257_v56 = vld [vmem:[%s1826_s4 + $0x24] sm:$0x3]  ;;  %v787_v0 = vrot.slane %v1256_v51, %v1483_v46  ;;  %v1258_v2 = vld [vmem:[%s1826_s4 + $0x26] sm:$0x3]  ;;  %v1262_v51 = vld [vmem:[%s1826_s4 + $0x2e] sm:$0x3] }
 0x192   : > { %v662_v11 = vsel %vm661_vm14, %v658_v27, %v660_v31  ;;  %v663_v39 = vsel %vm661_vm14, %v660_v31, %v658_v27  ;;  %v1255_v27 = vld [vmem:[%s1826_s4 + $0x20] sm:$0x3] }
 0x193   : > { %v678_v37 = vmul.f32 %v674_v30, %v662_v11  ;;  %v677_v31 = vmul.f32 %v670_v17, %v663_v39  ;;  %v1015_v36 = vpack.c.bf16 %v653_v16, %v629_v26  ;;  %v711_v30 = vrot.slane %v1253_v20, %v1474_v42 }
 0x194   : > { %1057 = vmatpush1.bf16.msra.mxu1 %v1011_v54  ;;  %v759_v16 = vrot.slane %v1255_v27, %v1474_v42  ;;  %v804_v20 = vrot.slane %v1257_v56, %v1483_v46 }
 0x195   : > { %v699_v62 = vpop.permute.xlu1 %698  ;;  %v701_v1 = vpop.permute.xlu0 %700  ;;  %1058 = vmatprep.subr.bf16.mxu1 %v1014_v63  ;;  %v1018_v44 = vpack.c.bf16 %v695_v48, %v678_v37  ;;  %v763_v63 = vrot.slane %v1255_v27, %v1483_v46  ;;  %v1017_v17 = vpack.c.bf16 %v694_v8, %v677_v31  ;;  %v1260_v37 = vld [vmem:[%s1826_s4 + $0x2a] sm:$0x3]  ;;  %v800_v48 = vrot.slane %v1257_v56, %v1474_v42 }
 0x196   : > { %v704_v13 = vsel %vm702_vm0, %v701_v1, %v699_v62  ;;  %v703_v10 = vsel %vm702_vm0, %v699_v62, %v701_v1 }
 0x197   : > { %v719_v11 = vmul.f32 %v715_v47, %v704_v13  ;;  %v1259_v47 = vld [vmem:[%s1826_s4 + $0x28] sm:$0x3]  ;;  %v855_v13 = vrot.slane %v1260_v37, %v1483_v46 }
 0x198   : > { %1059 = vmatpush1.bf16.msra.mxu1 %v1013_v35 }
 0x199   : > { %v723_v43 = vpop.permute.xlu1 %722  ;;  %v725_v25 = vpop.permute.xlu0 %724  ;;  %1060 = vmatprep.subr.bf16.mxu1 %v1016_v23  ;;  %v859_v56 = vmul.f32 %v855_v13, %v1533_v9  ;;  %v885_v9 = vrot.slane %v1262_v51, %v1474_v42 }
 0x19a   : > { %v728_v34 = vsel %vm726_vm15, %v725_v25, %v723_v43  ;;  %v727_v53 = vsel %vm726_vm15, %v723_v43, %v725_v25  ;;  %v718_v43 = vmul.f32 %v711_v30, %v703_v10  ;;  %v821_v25 = vrot.slane %v1258_v2, %v1483_v46  ;;  %v1264_v10 = vld [vmem:[%s1826_s4 + $0x32] sm:$0x3] }
 0x19b   : > { %v743_v54 = vmul.f32 %v739_v24, %v728_v34  ;;  %v742_v38 = vmul.f32 %v735_v49, %v727_v53  ;;  %v808_v49 = vmul.f32 %v804_v20, %v1515_v61  ;;  %v1261_v61 = vld [vmem:[%s1826_s4 + $0x2c] sm:$0x3]  ;;  %v889_v30 = vrot.slane %v1262_v51, %v1483_v46 }
 0x19c   : > { %1061 = vmatpush1.bf16.msra.mxu1 %v1015_v36  ;;  %v817_v36 = vrot.slane %v1258_v2, %v1474_v42  ;;  %v1094_v51 = vld [vmem:[%s1825_s3 + $0x8] sm:$0xff] }
 0x19d   : > { %v747_v18 = vpop.permute.xlu1 %746  ;;  %v749_v55 = vpop.permute.xlu0 %748  ;;  %1062 = vmatprep.subr.bf16.mxu1 %v1018_v44  ;;  %v1020_v39 = vpack.c.bf16 %v743_v54, %v719_v11  ;;  %v1019_v31 = vpack.c.bf16 %v742_v38, %v718_v43  ;;  %v825_v54 = vmul.f32 %v821_v25, %v1497_v52  ;;  %v851_v44 = vrot.slane %v1260_v37, %v1474_v42 }
 0x19e   : > { %v752_v15 = vsel %vm750_vm1, %v749_v55, %v747_v18  ;;  %v751_v62 = vsel %vm750_vm1, %v747_v18, %v749_v55  ;;  %v838_v18 = vrot.slane %v1259_v47, %v1483_v46  ;;  %v807_v55 = vmul.f32 %v800_v48, %v1513_v60 }
 0x19f   : > { %v767_v26 = vmul.f32 %v763_v63, %v752_v15  ;;  %v766_v27 = vmul.f32 %v759_v16, %v751_v62  ;;  %v1024_v63 = vpack.c.bf16 %v825_v54, %v808_v49  ;;  %v824_v8 = vmul.f32 %v817_v36, %v1504_v57  ;;  %v1263_v57 = vld [vmem:[%s1826_s4 + $0x30] sm:$0x3]  ;;  %v1093_v36 = vld [vmem:[%s1825_s3] sm:$0xff] }
 0x1a0   : > { %1063 = vmatpush1.bf16.msra.mxu1 %v1017_v17  ;;  %v834_v52 = vrot.slane %v1259_v47, %v1474_v42  ;;  %v842_v11 = vmul.f32 %v838_v18, %v1552_v22  ;;  %v858_v60 = vmul.f32 %v851_v44, %v1508_v58  ;;  %v893_v2 = vmul.f32 %v889_v30, %v1571_v29  ;;  %v1265_v58 = vld [vmem:[%s1826_s4 + $0x34] sm:$0x3] }
 0x1a1   : > { %v771_v1 = vpop.permute.xlu1 %770  ;;  %v773_v35 = vpop.permute.xlu0 %772  ;;  %1064 = vmatprep.subr.bf16.mxu1 %v1020_v39  ;;  %v923_v38 = vrot.slane %v1264_v10, %v1483_v46  ;;  %v868_v22 = vrot.slane %v1261_v61, %v1474_v42  ;;  %v906_v20 = vrot.slane %v1263_v57, %v1483_v46  ;;  %v892_v62 = vmul.f32 %v885_v9, %v1545_v19 }
 0x1a2   : > { %v775_v23 = vsel %vm774_vm2, %v771_v1, %v773_v35  ;;  %v776_v24 = vsel %vm774_vm2, %v773_v35, %v771_v1  ;;  %v1026_v16 = vpack.c.bf16 %v859_v56, %v842_v11  ;;  %v841_v15 = vmul.f32 %v834_v52, %v1527_v6 }
 0x1a3   : > { %v790_v34 = vmul.f32 %v783_v14, %v775_v23  ;;  %v791_v41 = vmul.f32 %v787_v0, %v776_v24  ;;  %v872_v14 = vrot.slane %v1261_v61, %v1483_v46  ;;  %v1023_v0 = vpack.c.bf16 %v824_v8, %v807_v55 }
 0x1a4   : > { %1065 = vmatpush1.bf16.msra.mxu1 %v1019_v31  ;;  %v919_v29 = vrot.slane %v1264_v10, %v1474_v42  ;;  %v1025_v1 = vpack.c.bf16 %v858_v60, %v841_v15  ;;  %v927_v35 = vmul.f32 %v923_v38, %v1615_v33  ;;  %v936_v6 = vrot.slane %v1265_v58, %v1474_v42 }
 0x1a5   : > { %v1022_v40 = vpack.c.bf16 %v791_v41, %v767_v26  ;;  %v1021_v53 = vpack.c.bf16 %v790_v34, %v766_v27  ;;  %v876_v17 = vmul.f32 %v872_v14, %v1595_v50  ;;  %v940_v39 = vrot.slane %v1265_v58, %v1483_v46 }
 0x1a6   : > { %v875_v43 = vmul.f32 %v868_v22, %v1564_v28  ;;  %v902_v23 = vrot.slane %v1263_v57, %v1474_v42  ;;  %v910_v50 = vmul.f32 %v906_v20, %v1632_v45  ;;  %v926_v19 = vmul.f32 %v919_v29, %v1586_v32  ;;  %v947_v42 = vld [vmem:[%s1824_s2] sm:$0xff] }
 0x1a7   : > { %1066 = vmatprep.subr.bf16.mxu1 %v1022_v40  ;;  %v1028_v37 = vpack.c.bf16 %v893_v2, %v876_v17  ;;  %v943_v25 = vmul.f32 %v936_v6, %v1642_v21  ;;  %v944_v33 = vmul.f32 %v940_v39, %v1663_v12  ;;  %v949_v45 = vpack.c.bf16 %v947_v42, %v947_v42 }
 0x1a8   : > { %1067 = vmatpush1.bf16.msra.mxu1 %v1021_v53  ;;  %v1027_v24 = vpack.c.bf16 %v892_v62, %v875_v43  ;;  %v1030_v26 = vpack.c.bf16 %v927_v35, %v910_v50  ;;  %v909_v34 = vmul.f32 %v902_v23, %v1608_v59  ;;  %v1095_v18 = vpack.c.bf16 %v1094_v51, %v1093_v36 }
 0x1a9   : > { %1068 = vmatprep.subr.bf16.mxu1 %v1024_v63  ;;  %v1031_v28 = vpack.c.bf16 %v943_v25, %v943_v25  ;;  %v1032_v41 = vpack.c.bf16 %v944_v33, %v944_v33 }
 0x1aa   : > { %v1029_v46 = vpack.c.bf16 %v926_v19, %v909_v34 }
 0x1ab   : > { %v1045_v32 = vsel %vm1043_vm3, %v1031_v28, 0 }
 0x1ac   : > { %1069 = vmatpush1.bf16.msra.mxu1 %v1023_v0 }
 0x1ad   : > { %1070 = vmatprep.subr.bf16.mxu1 %v1026_v16 }
 0x1b0   : > { %1071 = vmatpush1.bf16.msra.mxu1 %v1025_v1 }
 0x1b1   : > { %1072 = vmatprep.subr.bf16.mxu1 %v1028_v37 }
 0x1b2   : > { %v1037_v21 = vpop.permute.xlu1 %1036  ;;  %v1103_v44 = vpop.permute.xlu0 %1102 }
 0x1b4   : > { %1073 = vmatpush1.bf16.msra.mxu1 %v1027_v24 }
 0x1b5   : > { %1074 = vmatprep.subr.bf16.mxu1 %v1030_v26 }
 0x1b6   : > { %v1108_v30 = vpop.permute.xlu1 %1107 }
 0x1b8   : > { %1075 = vmatpush1.bf16.msra.mxu1 %v1029_v46 }
 0x1b9   : > { %1266 = vmatprep.subr.msk.bf16.mxu1 %vm1043_vm3, %v1032_v41 }
 0x1bc   : > { %1077 = vmatpush1.bf16.msra.mxu1 %v1045_v32 }
 0x1bf   : > { %1083 = vmatmul.mubr.bf16.vlgmr.msra.gmra.mrb[0].mxu1 %v949_v45 }
 0x292   : > { %v1084_v59 = vpop.f32.mrb[0].mxu1 }
 0x293   : > { %v1085_v12 = vadd.f32 %v1084_v59, %v1037_v21  ;;  %v1086_v47 = vpop.f32.mrb[1].mxu1 }
 0x294   : > { %v1087_v48 = vadd.f32 %v1086_v47, %v1037_v21  ;;  %v1088_v27 = vpop.f32.mrb[2].mxu1 }
 0x295   : > { %v1091_v31 = vmax.f32 %v1085_v12, 0.0  ;;  %v1089_v13 = vpop.f32.mrb[3].mxu1 }
 0x296   : > { %v1092_v49 = vmax.f32 %v1087_v48, 0.0 }
 0x297   : > { %v1096_v40 = vpack.c.bf16 %v1091_v31, %v1091_v31 }
 0x298   : > { %v1097_v53 = vpack.c.bf16 %v1092_v49, %v1092_v49 }
 0x299   : > { %v1115_v54 = vsel %vm1043_vm3, %v1096_v40, 0 }
 0x29a   : > { %1268 = vmatprep.subr.msk.bf16.mxu0 %vm1043_vm3, %v1097_v53 }
 0x29b   : > { %1121 = vmatpush1.bf16.msra.mxu0 %v1115_v54 }
 0x29e   : > { %1269 = vmatmul.mubr.msk.bf16.vlgmr.msra.gmra.mrb[4].mxu0 %vm1110_vm4, %v1095_v18 }
 0x371   : > { %v1154_v61 = vpop.f32.mrb[4].mxu0 }
 0x372   : > { %v1155_v55 = vadd.f32 %v1154_v61, %v1103_v44  ;;  %v1156_v56 = vpop.f32.mrb[5].mxu0 }
 0x373   : > { %v1157_v63 = vadd.f32 %v1156_v56, %v1103_v44  ;;  %v1158_v8 = vpop.f32.mrb[6].mxu0 }
 0x374   : > { %v1163_v52 = vadd.f32 %v1155_v55, %v1399_v5  ;;  %v1159_v10 = vadd.f32 %v1158_v8, %v1108_v30  ;;  %v1160_v11 = vpop.f32.mrb[7].mxu0 }
 0x375   : > { %v1164_v14 = vadd.f32 %v1157_v63, %v1395_v3  ;;  %v1161_v60 = vadd.f32 %v1160_v11, %v1108_v30 }
 0x376   : > { %v1167_v9 = vmax.f32 %v1163_v52, 0.0  ;;  %v1165_v57 = vadd.f32 %v1159_v10, %v1403_v7 }
 0x377   : > { %v1168_v0 = vmax.f32 %v1164_v14, 0.0  ;;  %v1166_v2 = vadd.f32 %v1161_v60, %v1397_v4 }
 0x378   : > { %1171 = vst [vmem:[%s305_s26] sm:$0xff] %v1167_v9  ;;  %v1169_v38 = vmax.f32 %v1165_v57, 0.0 }
 0x379   : > { %1172 = vst [vmem:[%s305_s26 + $0x8] sm:$0xff] %v1168_v0  ;;  %v1170_v5 = vmax.f32 %v1166_v2, 0.0 }
 0x37a   : > { %1173 = vst [vmem:[%s305_s26 + $0x10] sm:$0xff] %v1169_v38 }
 0x37b   : > { %1174 = vst [vmem:[%s305_s26 + $0x18] sm:$0xff] %v1170_v5 }
 0x37c PF: > { %s18_s27 = sadd.s32 1, %s1308_s27  }
 0x37d   : > { %p15_p4 = scmp.ge.s32.totalorder %s18_s27, 4  }
 0x37f   :  { %17 = sbr.rel (!%p15_p4) target bundleno = 1 (0x1), region = 108 }

</bundles_post_ra>
